<compile_context>
chip_gen: v7x
topology: tpu7x:2x2x1
jax: 0.10.0
libtpu: 0.0.40
codegen_flags: <defaults>
</compile_context>

<pallas_src>
from functools import partial

import jax
import jax.numpy as jnp
from jax import lax
from jax.experimental import pallas as pl
from jax.experimental.pallas import tpu as pltpu


_SUBLANE = 16          # sublane alignment that covers both f32 (8) and bf16 (16) packing
_V7X_SPLIT_MIN = 2048  # folded-row count above which we force >= 2 grid steps (v7x 2 TCs)


def _round_up(n, m):
    return ((n + m - 1) // m) * m


def _fold_weight(w, f):
    """Block-diagonal weight: W_f[j*N+n, j*K+k] = W[n, k] for j in range(f)."""
    if f == 1:
        return w
    N, K = w.shape
    wf = jnp.zeros((f, N, f, K), dtype=w.dtype)
    idx = jnp.arange(f)
    wf = wf.at[idx, :, idx, :].set(w)          # broadcast W onto the diagonal blocks
    return wf.reshape(f * N, f * K)


def _linear_kernel(x_ref, w_ref, o_ref, *, compute_dtype):
    # x_ref: [tb, Kf] VMEM tile, w_ref: [Nf, Kf] (PyTorch layout), o_ref: [tb, Nf]
    x = x_ref[...]
    if compute_dtype is not None and x.dtype != compute_dtype:
        x = x.astype(compute_dtype)            # cast in-kernel: no extra HBM pass over x
    # Contract K (axis 1 of both operands) directly on the MXU — no transpose needed.
    o_ref[...] = lax.dot_general(
        x,
        w_ref[...],
        dimension_numbers=(((1,), (1,)), ((), ())),
        preferred_element_type=jnp.float32,
    ).astype(o_ref.dtype)


def linear_no_bias(x, weight, *, block_b=8192, compute_dtype=None, out_dtype=None,
                   use_pallas=None, min_pallas_batch=256):
    """x: [B, in_features], weight: [out_features, in_features] (PyTorch layout)."""
    B, K = x.shape
    N, K2 = weight.shape
    assert K == K2, "in_features mismatch"
    out_dtype = x.dtype if out_dtype is None else out_dtype

    if use_pallas is None:
        use_pallas = B >= min_pallas_batch
    if not use_pallas:
        # Tiny batches: a fused XLA dot beats a standalone custom call.
        return jnp.dot(x, weight.T).astype(out_dtype)

    # ---- batch folding: present a lane-dense (>=128) output to the store unit ----
    f = 2 if (B % 2 == 0) else 1               # 64*f = 128 lanes when possible
    Bf, Kf, Nf = B // f, K * f, N * f

    x_f = x.reshape(Bf, Kf)                    # metadata-only (row-major) reshape
    w_f = _fold_weight(weight, f)              # [Nf, Kf] block-diagonal, tiny
    if compute_dtype is not None:
        w_f = w_f.astype(compute_dtype)        # static param: cast once, off hot path

    # ---- batch-tile selection (in folded rows) ----
    tb = min(max(block_b // f, _SUBLANE), Bf)
    if Bf >= _V7X_SPLIT_MIN:                   # keep >= 2 grid steps for v7x's 2 TCs
        tb = min(tb, _round_up(pl.cdiv(Bf, 2), _SUBLANE))
    if tb < Bf:
        tb = min(_round_up(tb, _SUBLANE), _SUBLANE * pl.cdiv(Bf, _SUBLANE))
        tb = min(tb, Bf) if tb >= Bf else tb   # full dim if rounding reaches/exceeds Bf
    grid = (pl.cdiv(Bf, tb),)

    x_bytes = jnp.dtype(x.dtype).itemsize
    w_bytes = jnp.dtype(w_f.dtype).itemsize
    o_bytes = jnp.dtype(out_dtype).itemsize
    cost = pl.CostEstimate(
        flops=2 * Bf * Kf * Nf,
        transcendentals=0,
        bytes_accessed=x_bytes * B * K + w_bytes * Nf * Kf + o_bytes * B * N,
    )

    out_f = pl.pallas_call(
        partial(_linear_kernel, compute_dtype=compute_dtype),
        out_shape=jax.ShapeDtypeStruct((Bf, Nf), out_dtype),
        grid=grid,
        in_specs=[
            pl.BlockSpec((tb, Kf), lambda i: (i, 0)),   # x: streamed over batch tiles
            pl.BlockSpec((Nf, Kf), lambda i: (0, 0)),   # W_f: same block -> VMEM-resident
        ],
        out_specs=pl.BlockSpec((tb, Nf), lambda i: (i, 0)),
        compiler_params=pltpu.CompilerParams(
            dimension_semantics=("parallel",),          # v7x shards batch tiles over 2 TCs
        ),
        cost_estimate=cost,
    )(x_f, w_f)

    return out_f.reshape(B, N)                 # metadata-only reshape back to [B, 64]


if __name__ == "__main__":
    key = jax.random.PRNGKey(0)
    kx, kw, kx2, kx3 = jax.random.split(key, 4)

    IN, OUT = 20, 64
    # Deterministic parameter init (mimics nn.Linear default: U(-1/sqrt(in), 1/sqrt(in)))
    bound = 1.0 / (IN ** 0.5)
    weight = jax.random.uniform(kw, (OUT, IN), dtype=jnp.float32,
                                minval=-bound, maxval=bound)

    # 1) Small batch, forced Pallas path, f32 compute (module-contract, bit-tight check).
    B = 8
    x = jax.random.normal(kx, (B, IN), dtype=jnp.float32)
    ref = x @ weight.T
    out = jax.block_until_ready(linear_no_bias(x, weight, use_pallas=True))
    assert out.shape == (B, OUT) and out.dtype == jnp.float32
    assert jnp.allclose(out, ref, atol=1e-5, rtol=1e-5)

    # 2) Small batch, auto dispatch (falls back to a fused XLA dot).
    out_auto = jax.block_until_ready(linear_no_bias(x, weight))
    assert jnp.allclose(out_auto, ref, atol=1e-5, rtol=1e-5)

    # 3) Large even batch: batch-fold f=2 (lane-dense [tb,128] stores), bf16 compute +
    #    bf16 output, grid split into >= 2 steps (exercises tiling / parallel axis).
    B2 = 4096
    x2 = jax.random.normal(kx2, (B2, IN), dtype=jnp.float32)
    ref2 = x2 @ weight.T
    out2 = jax.block_until_ready(
        linear_no_bias(x2, weight, compute_dtype=jnp.bfloat16, out_dtype=jnp.bfloat16))
    assert out2.shape == (B2, OUT) and out2.dtype == jnp.bfloat16
    assert jnp.allclose(out2.astype(jnp.float32), ref2, atol=2e-2, rtol=2e-2)

    # 4) Odd batch: folding disabled (f=1), full-dim blocks, f32 path.
    B3 = 1001
    x3 = jax.random.normal(kx3, (B3, IN), dtype=jnp.float32)
    ref3 = x3 @ weight.T
    out3 = jax.block_until_ready(linear_no_bias(x3, weight))
    assert out3.shape == (B3, OUT)
    assert jnp.allclose(out3, ref3, atol=1e-5, rtol=1e-5)

    print("KERNEL_OK")
</pallas_src>

<mosaic_0001>
module attributes {stable_mosaic.version = 11 : i64} {
  func.func @_linear_kernel(%arg0: i32, %arg1: memref<4x40xf32, #tpu.memory_space<vmem>>, %arg2: memref<128x40xf32, #tpu.memory_space<vmem>>, %arg3: memref<4x128xf32, #tpu.memory_space<vmem>>) attributes {dimension_semantics = [#tpu.dimension_semantics<parallel>], iteration_bounds = array<i64: 1>, scalar_prefetch = 0 : i64, scratch_operands = 0 : i64, tpu.core_type = #tpu.core_type<tc>, window_params = [{transform_indices = @transform_0, window_bounds = array<i64: 4, 40>}, {pipeline_mode = #tpu.pipeline_mode<synchronous>, transform_indices = @transform_1, window_bounds = array<i64: 128, 40>}, {transform_indices = @transform_2, window_bounds = array<i64: 4, 128>}]} {
    %c0 = arith.constant 0 : index
    %c0_0 = arith.constant 0 : index
    %0 = vector.load %arg1[%c0, %c0_0] : memref<4x40xf32, #tpu.memory_space<vmem>>, vector<4x40xf32>
    %c0_1 = arith.constant 0 : index
    %c0_2 = arith.constant 0 : index
    %1 = vector.load %arg2[%c0_1, %c0_2] : memref<128x40xf32, #tpu.memory_space<vmem>>, vector<128x40xf32>
    %cst = arith.constant dense<0.000000e+00> : vector<4x128xf32>
    %2 = tpu.matmul %0, %1, %cst {dimension_numbers = #tpu.dot_dimension_numbers<[1], [1], [0], [0], [0, 0, 1, 0], [], []>} : vector<4x40xf32>, vector<128x40xf32>, vector<4x128xf32> -> vector<4x128xf32>
    %c0_3 = arith.constant 0 : index
    %c0_4 = arith.constant 0 : index
    %3 = vector.load %arg3[%c0_3, %c0_4] : memref<4x128xf32, #tpu.memory_space<vmem>>, vector<4x128xf32>
    tpu.vector_store %arg3[%c0_3, %c0_4], %2 {strides = array<i32>} : memref<4x128xf32, #tpu.memory_space<vmem>>, vector<4x128xf32>,
    return
  }
  func.func @transform_0(%arg0: i32) -> (i32, i32) {
    %c0_i32 = arith.constant 0 : i32
    %c0_i32_0 = arith.constant 0 : i32
    return %arg0, %c0_i32 : i32, i32
  }
  func.func @transform_1(%arg0: i32) -> (i32, i32) {
    %c0_i32 = arith.constant 0 : i32
    %c0_i32_0 = arith.constant 0 : i32
    %c0_i32_1 = arith.constant 0 : i32
    return %c0_i32, %c0_i32_0 : i32, i32
  }
  func.func @transform_2(%arg0: i32) -> (i32, i32) {
    %c0_i32 = arith.constant 0 : i32
    %c0_i32_0 = arith.constant 0 : i32
    return %arg0, %c0_i32 : i32, i32
  }
}

</mosaic_0001>

<bundles_post_ra>
// kernel: tpu_custom_call.1
= control target key start
LH: loop header
LB: loop body
LE: loop exit
PB: predicated region body
PF: predicated region fallthrough
CT: control target
= control target key end

     0   :  { %vm29_vm0 = vcmask 326656   ;;  %v295_v2 = vmov 0.0|0.0   ;;  %vm296_vm2 = vmmov 0   ;;  %v297_v5 = vmov 0.0   ;;  %s400_s0 = inlined_call_operand.vmem [shape: f32[4,40], index: 0, kind: input, shape index: {}]   ;;  %s401_s1 = inlined_call_operand.vmem [shape: f32[128,40], index: 1, kind: input, shape index: {}]   ;;  %s402_s2 = inlined_call_operand.hbm [shape: f32[4,128], index: 2, kind: output, shape index: {}]  }
   0x1   :  { %v13_v0 = vld [vmem:[%s401_s1] sm:$0xff]  ;;  %v14_v1 = vld [vmem:[%s401_s1 + $0x8] sm:$0xff]  ;;  %235 = vmatprep.subr.bf16.mxu0 %v295_v2  ;;  %vm322_vm1 = vmpackc.low %vm29_vm0, %vm29_vm0  ;;  %232 = vmatprep.mubr.msk.f32.mxu0 %vm296_vm2, %v297_v5 }
   0x2   :  { %v236_v3 = vpack.c.bf16 %v14_v1, %v13_v0  ;;  %v15_v6 = vld [vmem:[%s401_s1 + $0x10] sm:$0xff]  ;;  %v16_v7 = vld [vmem:[%s401_s1 + $0x18] sm:$0xff] }
   0x4   :  { %238 = vmatpush3.bf16.xpose.msk.msra.mxu0 %vm322_vm1, %v236_v3 }
   0x5   :  { %239 = vmatprep.subr.bf16.mxu0 %v295_v2 }
   0x6   :  { %7 = vsyncpa [#allocation3], 0  ;;  %v240_v8 = vpack.c.bf16 %v16_v7, %v15_v6  ;;  %v17_v9 = vld [vmem:[%s401_s1 + $0x20] sm:$0xff]  ;;  %v18_v10 = vld [vmem:[%s401_s1 + $0x28] sm:$0xff]  ;;  %s298_s15 = smov [#allocation2]  }
   0x7   :  { %v244_v11 = vpack.c.bf16 %v18_v10, %v17_v9  ;;  %v19_v12 = vld [vmem:[%s401_s1 + $0x30] sm:$0xff]  ;;  %v20_v13 = vld [vmem:[%s401_s1 + $0x38] sm:$0xff]  ;;  %v21_v15 = vld [vmem:[%s401_s1 + $0x40] sm:$0xff]  ;;  %s158_s16 = sshll.u32 %s298_s15, 4  ;;  %s159_s16 = int_to_ptr.vmem [resolvable:$true] %s158_s16 }
   0x8   :  { %v248_v14 = vpack.c.bf16 %v20_v13, %v19_v12  ;;  %v22_v16 = vld [vmem:[%s401_s1 + $0x48] sm:$0xff]  ;;  %v23_v18 = vld [vmem:[%s401_s1 + $0x50] sm:$0xff]  ;;  %v24_v19 = vld [vmem:[%s401_s1 + $0x58] sm:$0xff]  ;;  %s271_s17 = scalar_lea.vmem %s159_s16, 64  ;;  %p276_p1 = scmp.lt.s32.totalorder %s159_s16, %s159_s16 }
   0x9   :  { %v252_v17 = vpack.c.bf16 %v22_v16, %v21_v15  ;;  %v256_v20 = vpack.c.bf16 %v24_v19, %v23_v18  ;;  %v25_v21 = vld [vmem:[%s401_s1 + $0x60] sm:$0xff]  ;;  %v26_v22 = vld [vmem:[%s401_s1 + $0x68] sm:$0xff]  ;;  %v27_v24 = vld [vmem:[%s401_s1 + $0x70] sm:$0xff]  ;;  %p272_p0 = scmp.ne.s32.totalorder %s159_s16, %s271_s17  ;;  %p277_p2 = scmp.lt.s32.totalorder %s271_s17, %s271_s17 }
   0xa   :  { %v260_v23 = vpack.c.bf16 %v26_v22, %v25_v21  ;;  %v28_v25 = vld [vmem:[%s401_s1 + $0x78] sm:$0xff]  ;;  %v12_v27 = vld [vmem:[%s400_s0] sm:$0xf] }
   0xb   :  { %v264_v26 = vpack.c.bf16 %v28_v25, %v27_v24  ;;  %p278_p3 = por %p277_p2, %p276_p1 }
   0xc   :  { %242 = vmatpush3.bf16.xpose.msk.msra.mxu0 %vm322_vm1, %v240_v8 }
   0xd   :  { %243 = vmatprep.subr.bf16.mxu0 %v295_v2  ;;  %p279_p4 = pnand %p278_p3, %p272_p0 }
  0x14   :  { %246 = vmatpush3.bf16.xpose.msk.msra.mxu0 %vm322_vm1, %v244_v11 }
  0x15   :  { %247 = vmatprep.subr.bf16.mxu0 %v295_v2 }
  0x1c   :  { %250 = vmatpush3.bf16.xpose.msk.msra.mxu0 %vm322_vm1, %v248_v14 }
  0x1d   :  { %251 = vmatprep.subr.bf16.mxu0 %v295_v2 }
  0x24   :  { %254 = vmatpush3.bf16.xpose.msk.msra.mxu0 %vm322_vm1, %v252_v17 }
  0x25   :  { %255 = vmatprep.subr.bf16.mxu0 %v295_v2 }
  0x2c   :  { %258 = vmatpush3.bf16.xpose.msk.msra.mxu0 %vm322_vm1, %v256_v20 }
  0x2d   :  { %259 = vmatprep.subr.bf16.mxu0 %v295_v2 }
  0x34   :  { %262 = vmatpush3.bf16.xpose.msk.msra.mxu0 %vm322_vm1, %v260_v23 }
  0x35   :  { %263 = vmatprep.subr.bf16.mxu0 %v295_v2 }
  0x3c   :  { %266 = vmatpush3.bf16.xpose.msk.msra.mxu0 %vm322_vm1, %v264_v26 }
  0x43   :  { %233 = vmatmul.mubr.msk.f32.vlgmr.msra.gmra.mrb[0].mxu0 %vm29_vm0, %v12_v27 }
 0x116   :  { %v147_v28 = vpop.f32.mrb[0].mxu0 }
 0x117   :  { %151 = vst [vmem:[#allocation2] sm:$0xf] %v147_v28  ;;  %v234_v29 = vpop.f32.mrb[1].mxu0 }
 0x118   :  { %282 = shalt.err (!%p279_p4)
}
 0x119   :  { %s283_s19 = scalar_lea.hbm %s402_s2, 64 }
 0x11a   :  { %p284_p5 = scmp.ne.s32.totalorder %s402_s2, %s283_s19  ;;  %p287_p6 = scmp.lt.u32.totalorder %s283_s19, %s402_s2 }
 0x11c   :  { %p289_p7 = pnand %p287_p6, %p284_p5 }
 0x11e   :  { %292 = shalt.err (!%p289_p7)
}
 0x11f   :  { %161 = dma.vmem_to_hbm [thread:$0]  %s159_s16, 64, %s402_s2, [#allocation3]  }
 0x120   :  { %293 = dma.done.wait [#allocation3], 64  }
 0x121   :  { %294 = vsyncadd [#allocation3], 4294967232 }
 0x122   :  { %165 = vsyncpa [#allocation3], 1 }

</bundles_post_ra>
